<compile_context>
chip_gen: v7x
topology: tpu7x:2x2x1
jax: 0.10.0
libtpu: 0.0.40
codegen_flags: <defaults>
</compile_context>

<pallas_src>
import functools

import jax
import jax.numpy as jnp
from jax.experimental import pallas as pl
from jax.experimental.pallas import tpu as pltpu


# Per-step VMEM budget used to cap the spatial tile (leaves headroom for the
# double/triple-buffered windows inside the scoped limit below, and stays well
# clear of v7x's 64 MiB physical VMEM).
_VMEM_TILE_BUDGET = 24 * 1024 * 1024
_VMEM_LIMIT_BYTES = 48 * 1024 * 1024     # > 16 MiB (v5e) / 32 MiB (v6e/v7x) defaults
_SPATIAL_TILE_TARGET = 8192              # review: sweep 8192-16384
_IN_BUFFERS = 3                          # pipelining depth for the activation input
_MAX_IMAGES_PER_BLOCK = 8                # small-image regime batching cap


def _focus_conv_kernel(x_ref, w_ref, b_ref, o_ref, *, nb):
    """One grid step: y = SiLU(W @ x + b) for nb batch images.

    x_ref: (nb, 4*c1, tm)  space-to-depth activations; channels on sublanes,
                           spatial on lanes (lane-dense).
    w_ref: (c2, 4*c1)      1x1 conv weight with BN scale folded in (f32).
    b_ref: (c2, 1)         folded BN bias (f32).
    o_ref: (nb, c2, tm)    lane-dense output tile.
    """
    w = w_ref[...]
    b = b_ref[...]
    for i in range(nb):                           # static unroll; nb is small
        # Single MXU contraction over all 4 space-to-depth groups at once.
        y = jnp.dot(w, x_ref[i].astype(w.dtype),
                    preferred_element_type=jnp.float32)
        y = y + b                                 # BN bias (scale folded into W)
        # SiLU: sigmoid -> EUP, mul -> VPU; all in f32.
        o_ref[i] = (y * jax.nn.sigmoid(y)).astype(o_ref.dtype)


def _pick_tiles(batch, m_spatial, bytes_per_lane):
    """Choose (nb, tm): images per block and spatial (lane) tile size."""
    if m_spatial <= 1024:
        # Small-image regime: full spatial extent per block, several images per
        # block to amortize the ~0.35 us per-grid-step fixed cost.
        tm = m_spatial
        nb = min(batch, _MAX_IMAGES_PER_BLOCK,
                 max(1, _SPATIAL_TILE_TARGET // max(m_spatial, 1)))
        while batch % nb:                         # keep the batch grid exact
            nb -= 1
        return nb, tm
    # Large-image regime: big lane tile, multiple of 128 (masked tail block),
    # capped by the per-step VMEM budget.
    cap = max(128, int(_VMEM_TILE_BUDGET // bytes_per_lane) // 128 * 128)
    tm = min(_SPATIAL_TILE_TARGET, cap)
    tm = min(tm, m_spatial if m_spatial % 128 == 0 else (m_spatial // 128) * 128)
    return 1, tm


@functools.partial(jax.jit, static_argnames=("eps", "io_dtype"))
def focus_forward(x, w, gamma, beta, running_mean, running_var,
                  eps=1e-3, io_dtype=None):
    """Focus forward pass.

    x: (B, c1, H, W) NCHW.
    w: (c2, 4*c1, 1, 1) conv weight (no bias).
    gamma/beta/running_mean/running_var: (c2,) BatchNorm2d params (eval mode).
    io_dtype: optional activation/output I/O dtype (e.g. jnp.bfloat16); this op
              is HBM-bound so bf16 I/O ~halves wall time (recommended default on
              v5e).  Weight, bias, accumulation, BN and SiLU stay f32.
    Returns: (B, c2, H//2, W//2) NCHW.
    """
    B, c1, H, W = x.shape
    c2 = w.shape[0]
    H2, W2 = H // 2, W // 2
    M_s = H2 * W2                                  # spatial extent (lane axis)
    c_in = 4 * c1
    cdt = jnp.dtype(io_dtype) if io_dtype is not None else x.dtype

    # ---- space-to-depth (torch.cat channel order) as ONE operand -----------
    # Plain XLA slices + concat; allow_input_fusion below permits XLA to fuse
    # this producer into the pallas_call input DMA so it is not materialized as
    # a separate HBM pass.
    # TODO(synk): a fully in-kernel space-to-depth (review option (a)) needs a
    # lane-stride-2 column deinterleave; Mosaic has no reliably-lowering
    # primitive for that, so we use allow_input_fusion (option (b)) instead.
    xv = x.astype(cdt)
    xc = jnp.concatenate(
        [xv[:, :, 0::2, 0::2].reshape(B, c1, M_s),    # (h even, w even)
         xv[:, :, 1::2, 0::2].reshape(B, c1, M_s),    # (h odd,  w even)
         xv[:, :, 0::2, 1::2].reshape(B, c1, M_s),    # (h even, w odd)
         xv[:, :, 1::2, 1::2].reshape(B, c1, M_s)],   # (h odd,  w odd)
        axis=1)                                       # (B, 4*c1, M_s)

    # ---- fold BatchNorm (eval) into the conv weight / bias (both f32) ------
    scale = (gamma.astype(jnp.float32)
             / jnp.sqrt(running_var.astype(jnp.float32) + eps))          # (c2,)
    bias = (beta.astype(jnp.float32)
            - running_mean.astype(jnp.float32) * scale).reshape(c2, 1)   # (c2,1)
    wk = w.reshape(c2, c_in).astype(jnp.float32) * scale[:, None]        # (c2,4*c1)

    # ---- tiling -------------------------------------------------------------
    in_isz = jnp.dtype(cdt).itemsize
    out_isz = in_isz
    bytes_per_lane = (c_in * in_isz * _IN_BUFFERS    # buffered activation tiles
                      + c2 * out_isz * 2             # double-buffered output tile
                      + c2 * 4)                      # f32 pre-activation temp
    nb, tm = _pick_tiles(B, M_s, bytes_per_lane)
    n_tiles_m = pl.cdiv(M_s, tm)
    grid = (B // nb, n_tiles_m)

    act_spec_kwargs = {}
    if n_tiles_m >= _IN_BUFFERS:
        act_spec_kwargs["pipeline_mode"] = pl.Buffered(_IN_BUFFERS)
    act_spec = pl.BlockSpec((nb, c_in, tm), lambda bi, mi: (bi, 0, mi),
                            **act_spec_kwargs)

    cost = pl.CostEstimate(
        flops=2 * B * M_s * c_in * c2 + 4 * B * M_s * c2,
        transcendentals=B * M_s * c2,
        bytes_accessed=(B * c_in * M_s * in_isz
                        + B * c2 * M_s * out_isz
                        + (c2 * c_in + c2) * 4),
    )

    out = pl.pallas_call(
        functools.partial(_focus_conv_kernel, nb=nb),
        out_shape=jax.ShapeDtypeStruct((B, c2, M_s), cdt),
        grid=grid,
        in_specs=[
            act_spec,
            pl.BlockSpec((c2, c_in), lambda bi, mi: (0, 0)),   # resident weight
            pl.BlockSpec((c2, 1), lambda bi, mi: (0, 0)),      # resident bias
        ],
        out_specs=pl.BlockSpec((nb, c2, tm), lambda bi, mi: (bi, 0, mi)),
        compiler_params=pltpu.CompilerParams(
            dimension_semantics=("parallel", "parallel"),
            vmem_limit_bytes=_VMEM_LIMIT_BYTES,
            allow_input_fusion=[True, False, False],
        ),
        cost_estimate=cost,
    )(xc, wk, bias)

    # (B, c2, H2*W2) -> (B, c2, H2, W2): free reshape, already NCHW.
    return out.reshape(B, c2, H2, W2)


def _reference(x, w, gamma, beta, mean, var, eps=1e-3):
    """Pure-JAX reference of Focus (sanity check)."""
    p1 = x[:, :, 0::2, 0::2]
    p2 = x[:, :, 1::2, 0::2]
    p3 = x[:, :, 0::2, 1::2]
    p4 = x[:, :, 1::2, 1::2]
    xc = jnp.concatenate([p1, p2, p3, p4], axis=1)
    y = jnp.einsum("bchw,oc->bohw", xc, w.reshape(w.shape[0], w.shape[1]))
    scale = (gamma / jnp.sqrt(var + eps))[None, :, None, None]
    bias = (beta - mean * gamma / jnp.sqrt(var + eps))[None, :, None, None]
    y = y * scale + bias
    return y * jax.nn.sigmoid(y)


if __name__ == "__main__":
    # Small shapes: Focus(c1=4, c2=8, k=1, s=1), input (2, 4, 16, 16)
    B, c1, H, W = 2, 4, 16, 16
    c2 = 8

    key = jax.random.PRNGKey(0)
    kx, kw, kg, kb, km, kv = jax.random.split(key, 6)

    x = jax.random.normal(kx, (B, c1, H, W), dtype=jnp.float32)
    w = jax.random.normal(kw, (c2, 4 * c1, 1, 1), dtype=jnp.float32) * 0.1
    gamma = 1.0 + 0.1 * jax.random.normal(kg, (c2,), dtype=jnp.float32)
    beta = 0.1 * jax.random.normal(kb, (c2,), dtype=jnp.float32)
    running_mean = 0.1 * jax.random.normal(km, (c2,), dtype=jnp.float32)
    running_var = 1.0 + 0.1 * jax.random.uniform(kv, (c2,), dtype=jnp.float32)

    ref = _reference(x, w, gamma, beta, running_mean, running_var)

    # f32 I/O path (tight tolerance).
    out = focus_forward(x, w, gamma, beta, running_mean, running_var)
    out = jax.block_until_ready(out)
    assert out.shape == (B, c2, H // 2, W // 2), out.shape
    assert jnp.allclose(out, ref, atol=1e-5, rtol=1e-5), float(
        jnp.max(jnp.abs(out - ref))
    )

    # bf16 I/O path (recommended production path on v5e; weights/bias stay f32).
    out_bf16 = focus_forward(
        x, w, gamma, beta, running_mean, running_var, io_dtype=jnp.bfloat16
    )
    out_bf16 = jax.block_until_ready(out_bf16)
    assert out_bf16.shape == (B, c2, H // 2, W // 2), out_bf16.shape
    assert jnp.allclose(out_bf16.astype(jnp.float32), ref, atol=5e-2, rtol=5e-2), float(
        jnp.max(jnp.abs(out_bf16.astype(jnp.float32) - ref))
    )

    print("KERNEL_OK")
</pallas_src>

<mosaic_0001>
module attributes {stable_mosaic.version = 11 : i64} {
  func.func @_focus_conv_kernel(%arg0: i32, %arg1: i32, %arg2: memref<2x16x64xf32, #tpu.memory_space<vmem>>, %arg3: memref<8x16xf32, #tpu.memory_space<vmem>>, %arg4: memref<8x1xf32, #tpu.memory_space<vmem>>, %arg5: memref<2x8x64xf32, #tpu.memory_space<vmem>>) attributes {dimension_semantics = [#tpu.dimension_semantics<parallel>, #tpu.dimension_semantics<parallel>], iteration_bounds = array<i64: 1, 1>, scalar_prefetch = 0 : i64, scratch_operands = 0 : i64, tpu.core_type = #tpu.core_type<tc>, window_params = [{transform_indices = @transform_0, window_bounds = array<i64: 2, 16, 64>}, {pipeline_mode = #tpu.pipeline_mode<synchronous>, transform_indices = @transform_1, window_bounds = array<i64: 8, 16>}, {pipeline_mode = #tpu.pipeline_mode<synchronous>, transform_indices = @transform_2, window_bounds = array<i64: 8, 1>}, {transform_indices = @transform_3, window_bounds = array<i64: 2, 8, 64>}]} {
    %c0 = arith.constant 0 : index
    %c0_0 = arith.constant 0 : index
    %0 = vector.load %arg3[%c0, %c0_0] : memref<8x16xf32, #tpu.memory_space<vmem>>, vector<8x16xf32>
    %c0_1 = arith.constant 0 : index
    %c0_2 = arith.constant 0 : index
    %1 = vector.load %arg4[%c0_1, %c0_2] : memref<8x1xf32, #tpu.memory_space<vmem>>, vector<8x1xf32>
    %c0_3 = arith.constant 0 : index
    %c0_4 = arith.constant 0 : index
    %c0_5 = arith.constant 0 : index
    %2 = vector.load %arg2[%c0_3, %c0_4, %c0_5] : memref<2x16x64xf32, #tpu.memory_space<vmem>>, vector<1x16x64xf32>
    %3 = vector.shape_cast %2 : vector<1x16x64xf32> to vector<16x64xf32>
    %cst = arith.constant dense<0.000000e+00> : vector<8x64xf32>
    %4 = tpu.matmul %0, %3, %cst {dimension_numbers = #tpu.dot_dimension_numbers<[1], [0], [0], [1], [0, 0, 1, 1], [], []>} : vector<8x16xf32>, vector<16x64xf32>, vector<8x64xf32> -> vector<8x64xf32>
    %5 = vector.broadcast %1 : vector<8x1xf32> to vector<8x64xf32>
    %6 = arith.addf %4, %5 : vector<8x64xf32>
    %7 = arith.negf %6 : vector<8x64xf32>
    %8 = math.exp %7 : vector<8x64xf32>
    %cst_6 = arith.constant 1.000000e+00 : f32
    %9 = vector.broadcast %cst_6 : f32 to vector<8x64xf32>
    %10 = arith.addf %9, %8 : vector<8x64xf32>
    %11 = arith.divf %9, %10 : vector<8x64xf32>
    %12 = arith.mulf %6, %11 : vector<8x64xf32>
    %c0_7 = arith.constant 0 : index
    %c0_8 = arith.constant 0 : index
    %c0_9 = arith.constant 0 : index
    %13 = vector.load %arg5[%c0_7, %c0_8, %c0_9] : memref<2x8x64xf32, #tpu.memory_space<vmem>>, vector<1x8x64xf32>
    %14 = vector.shape_cast %13 : vector<1x8x64xf32> to vector<8x64xf32>
    %15 = vector.shape_cast %12 : vector<8x64xf32> to vector<1x8x64xf32>
    tpu.vector_store %arg5[%c0_7, %c0_8, %c0_9], %15 {strides = array<i32>} : memref<2x8x64xf32, #tpu.memory_space<vmem>>, vector<1x8x64xf32>,
    %c1 = arith.constant 1 : index
    %c0_10 = arith.constant 0 : index
    %c0_11 = arith.constant 0 : index
    %16 = vector.load %arg2[%c1, %c0_10, %c0_11] : memref<2x16x64xf32, #tpu.memory_space<vmem>>, vector<1x16x64xf32>
    %17 = vector.shape_cast %16 : vector<1x16x64xf32> to vector<16x64xf32>
    %cst_12 = arith.constant dense<0.000000e+00> : vector<8x64xf32>
    %18 = tpu.matmul %0, %17, %cst_12 {dimension_numbers = #tpu.dot_dimension_numbers<[1], [0], [0], [1], [0, 0, 1, 1], [], []>} : vector<8x16xf32>, vector<16x64xf32>, vector<8x64xf32> -> vector<8x64xf32>
    %19 = vector.broadcast %1 : vector<8x1xf32> to vector<8x64xf32>
    %20 = arith.addf %18, %19 : vector<8x64xf32>
    %21 = arith.negf %20 : vector<8x64xf32>
    %22 = math.exp %21 : vector<8x64xf32>
    %cst_13 = arith.constant 1.000000e+00 : f32
    %23 = vector.broadcast %cst_13 : f32 to vector<8x64xf32>
    %24 = arith.addf %23, %22 : vector<8x64xf32>
    %25 = arith.divf %23, %24 : vector<8x64xf32>
    %26 = arith.mulf %20, %25 : vector<8x64xf32>
    %c1_14 = arith.constant 1 : index
    %c0_15 = arith.constant 0 : index
    %c0_16 = arith.constant 0 : index
    %27 = vector.load %arg5[%c1_14, %c0_15, %c0_16] : memref<2x8x64xf32, #tpu.memory_space<vmem>>, vector<1x8x64xf32>
    %28 = vector.shape_cast %27 : vector<1x8x64xf32> to vector<8x64xf32>
    %29 = vector.shape_cast %26 : vector<8x64xf32> to vector<1x8x64xf32>
    tpu.vector_store %arg5[%c1_14, %c0_15, %c0_16], %29 {strides = array<i32>} : memref<2x8x64xf32, #tpu.memory_space<vmem>>, vector<1x8x64xf32>,
    return
  }
  func.func @transform_0(%arg0: i32, %arg1: i32) -> (i32, i32, i32) {
    %c0_i32 = arith.constant 0 : i32
    %c0_i32_0 = arith.constant 0 : i32
    return %arg0, %c0_i32, %arg1 : i32, i32, i32
  }
  func.func @transform_1(%arg0: i32, %arg1: i32) -> (i32, i32) {
    %c0_i32 = arith.constant 0 : i32
    %c0_i32_0 = arith.constant 0 : i32
    %c0_i32_1 = arith.constant 0 : i32
    return %c0_i32, %c0_i32_0 : i32, i32
  }
  func.func @transform_2(%arg0: i32, %arg1: i32) -> (i32, i32) {
    %c0_i32 = arith.constant 0 : i32
    %c0_i32_0 = arith.constant 0 : i32
    %c0_i32_1 = arith.constant 0 : i32
    return %c0_i32, %c0_i32_0 : i32, i32
  }
  func.func @transform_3(%arg0: i32, %arg1: i32) -> (i32, i32, i32) {
    %c0_i32 = arith.constant 0 : i32
    %c0_i32_0 = arith.constant 0 : i32
    return %arg0, %c0_i32, %arg1 : i32, i32, i32
  }
}

</mosaic_0001>

<bundles_post_ra>
// kernel: focus_forward.2
= control target key start
LH: loop header
LB: loop body
LE: loop exit
PB: predicated region body
PF: predicated region fallthrough
CT: control target
= control target key end

     0   :  { %v127_v1 = vlaneseq  ;;  %v557_v2 = vmov 0.0|0.0   ;;  %vm558_vm1 = vmmov 0   ;;  %v559_v13 = vmov 0.0   ;;  %s690_s0 = inlined_call_operand.vmem [shape: f32[8,16], index: 0, kind: input, shape index: {}]   ;;  %s691_s1 = inlined_call_operand.vmem [shape: f32[8,1], index: 1, kind: input, shape index: {}]   ;;  %s692_s2 = inlined_call_operand.vmem [shape: f32[2,4,64], index: 2, kind: input, shape index: {}]   ;;  %s693_s3 = inlined_call_operand.<no memory space> [shape: f32[], index: 3, kind: input, shape index: {}]   ;;  %s694_s4 = inlined_call_operand.vmem [shape: f32[2,4,64], index: 4, kind: input, shape index: {}]   ;;  %s695_s5 = inlined_call_operand.vmem [shape: f32[2,4,64], index: 5, kind: input, shape index: {}]   ;;  %s696_s6 = inlined_call_operand.vmem [shape: f32[2,4,64], index: 6, kind: input, shape index: {}]   ;;  %s697_s7 = inlined_call_operand.vmem [shape: f32[2,8,64], index: 7, kind: output, shape index: {}]  }
   0x1   :  { %v604_v0 = vstv %s693_s3  ;;  %538 = vmatprep.subr.bf16.mxu0 %v557_v2  ;;  %541 = vmatprep.subr.bf16.mxu1 %v557_v2  ;;  %v114_v3 = vld [vmem:[%s692_s2] sm:$0xf]  ;;  %v512_v9 = vld [vmem:[%s696_s6 + $0x4] sm:$0xf]  ;;  %vm137_vm4 = vcmask 1043456   ;;  %v560_v18 = vmov 0  }
   0x2   :  { %v120_v4 = vld [vmem:[%s694_s4] sm:$0xf]  ;;  %v128_v5 = vshrl.u32 %v127_v1, 7  ;;  %v133_v6 = vand.u32 127, %v127_v1  ;;  %v511_v12 = vld [vmem:[%s695_s5 + $0x4] sm:$0xf]  ;;  %528 = vmatprep.mubr.msk.f32.mxu0 %vm558_vm1, %v559_v13  ;;  %535 = vmatprep.mubr.msk.f32.mxu1 %vm558_vm1, %v559_v13 }
   0x3   :  { %v140_v7 = vld [vmem:[%s696_s6] sm:$0xf]  ;;  %548 = vset.pattern.permute.xlu0 %v560_v18  ;;  %v509_v25 = vld [vmem:[%s692_s2 + $0x4] sm:$0xf]  ;;  %vm322_vm6 = vcmask 130048   ;;  %vm403_vm7 = vcmask 523264  }
   0x4   :  { %v126_v8 = vld [vmem:[%s695_s5] sm:$0xf]  ;;  %v129_v10 = vadd.s32 8, %v128_v5  ;;  %vm144_vm0 = vcmp.lt.s32.totalorder %v128_v5, 4  ;;  %v167_v11 = vadd.s32 16, %v128_v5  ;;  %vm135_vm2 = vcmp.lt.s32.totalorder %v133_v6, 64 }
   0x5   :  { %v314_v14 = vld [vmem:[%s691_s1] sm:$0xff]  ;;  %v145_v15 = vsel %vm144_vm0, %v140_v7, %v604_v0  ;;  %v248_v16 = vsel %vm144_vm0, %v512_v9, %v604_v0 }
   0x6   :  { %vm130_vm3 = vcmp.lt.s32.totalorder %v129_v10, 12  ;;  %v150_v17 = vsel %vm135_vm2, %v145_v15, %v604_v0  ;;  %vm168_vm5 = vcmp.lt.s32.totalorder %v167_v11, 20  ;;  %319 = vperm.xlu0 %548, %v314_v14   ;;  %v510_v26 = vld [vmem:[%s694_s4 + $0x4] sm:$0xf]  ;;  %v253_v28 = vsel %vm135_vm2, %v248_v16, %v604_v0 }
   0x7   :  { %v131_v19 = vsel %vm130_vm3, %v126_v8, %v604_v0  ;;  %v169_v20 = vsel %vm168_vm5, %v114_v3, %v604_v0  ;;  %v182_v21 = vsel %vm130_vm3, %v120_v4, %v604_v0  ;;  %v233_v22 = vsel %vm130_vm3, %v511_v12, %v604_v0  ;;  %v313_v59 = vld [vmem:[%s690_s0] sm:$0xff] }
   0x8   :  { %v136_v23 = vsel %vm135_vm2, %v131_v19, %v604_v0  ;;  %v174_v24 = vsel %vm135_vm2, %v169_v20, %v604_v0  ;;  %v238_v27 = vsel %vm135_vm2, %v233_v22, %v604_v0  ;;  %v187_v34 = vsel %vm135_vm2, %v182_v21, %v604_v0 }
   0x9   :  { %v138_v29 = vsel %vm137_vm4, %v136_v23, %v604_v0  ;;  %v176_v30 = vsel %vm137_vm4, %v174_v24, %v604_v0  ;;  %v189_v31 = vsel %vm137_vm4, %v604_v0, %v136_v23  ;;  %v240_v32 = vsel %vm137_vm4, %v238_v27, %v604_v0 }
   0xa   :  { %v139_v33 = vrot.slane %v138_v29, 4  ;;  %v190_v35 = vrot.slane %v189_v31, 4  ;;  %v241_v36 = vrot.slane %v240_v32, 4  ;;  %v177_v37 = vrot.slane %v176_v30, 4 }
   0xb   :  { %v274_v38 = vsel %vm168_vm5, %v509_v25, %v604_v0  ;;  %v288_v39 = vsel %vm130_vm3, %v510_v26, %v604_v0  ;;  %v296_v40 = vsel %vm137_vm4, %v604_v0, %v238_v27 }
   0xc   :  { %v153_v41 = vmax.f32 %v150_v17, %v139_v33  ;;  %v193_v42 = vmax.f32 %v604_v0, %v190_v35  ;;  %v256_v43 = vmax.f32 %v253_v28, %v241_v36  ;;  %v279_v44 = vsel %vm135_vm2, %v274_v38, %v604_v0 }
   0xd   :  { %v281_v45 = vsel %vm137_vm4, %v279_v44, %v604_v0  ;;  %v297_v46 = vrot.slane %v296_v40, 4  ;;  %v293_v50 = vsel %vm135_vm2, %v288_v39, %v604_v0 }
   0xe   :  { %v157_v47 = vmax.f32 %v153_v41, %v604_v0  ;;  %v197_v48 = vmax.f32 %v193_v42, %v187_v34  ;;  %v260_v49 = vmax.f32 %v256_v43, %v604_v0  ;;  %v282_v51 = vrot.slane %v281_v45, 4 }
   0xf   :  { %v300_v52 = vmax.f32 %v604_v0, %v297_v46 }
  0x10   :  { %v161_v53 = vmax.f32 %v157_v47, %v604_v0  ;;  %v201_v54 = vmax.f32 %v197_v48, %v177_v37  ;;  %v264_v55 = vmax.f32 %v260_v49, %v604_v0 }
  0x11   :  { %v304_v56 = vmax.f32 %v300_v52, %v293_v50 }
  0x12   :  { %v539_v57 = vpack.c.bf16 %v201_v54, %v161_v53 }
  0x13   :  { %v308_v58 = vmax.f32 %v304_v56, %v282_v51 }
  0x14   :  { %540 = vmatpush3.bf16.msra.mxu0 %v539_v57 }
  0x15   :  { %v542_v60 = vpack.c.bf16 %v308_v58, %v264_v55 }
  0x17   :  { %543 = vmatpush3.bf16.msra.mxu1 %v542_v60  ;;  %529 = vmatmul.mubr.msk.f32.vlgmr.msra.gmra.mrb[0].mxu0 %vm322_vm6, %v313_v59 }
  0x1a   :  { %536 = vmatmul.mubr.msk.f32.vlgmr.msra.gmra.mrb[0].mxu1 %vm322_vm6, %v313_v59 }
  0x85   :  { %v320_v61 = vpop.permute.xlu0 %319 }
  0xea   :  { %v392_v62 = vpop.f32.mrb[0].mxu0 }
  0xeb   :  { %v393_v63 = vadd.f32 %v392_v62, %v320_v61  ;;  %v530_v1 = vpop.f32.mrb[1].mxu0 }
  0xed   :  { %v514_v2 = vmul.f32 -1.442695, %v393_v63  ;;  %v474_v3 = vpop.f32.mrb[0].mxu1 }
  0xee   :  { %v475_v0 = vadd.f32 %v474_v3, %v320_v61  ;;  %v537_v4 = vpop.f32.mrb[1].mxu1 }
  0xef   :  { %549 = vpow2.f32 %v514_v2 }
  0xf0   :  { %v516_v5 = vmul.f32 -1.442695, %v475_v0 }
  0xf2   :  { %551 = vpow2.f32 %v516_v5 }
  0xf9   :  { %v550_v6 = vpop.eup %549 }
  0xfa   :  { %v399_v7 = vadd.f32 1.0, %v550_v6 }
  0xfc   :  { %v552_v8 = vpop.eup %551  ;;  %553 = vrcp.f32 %v399_v7 }
  0xfd   :  { %v481_v9 = vadd.f32 1.0, %v552_v8 }
  0xff   :  { %555 = vrcp.f32 %v481_v9 }
 0x106   :  { %v554_v10 = vpop.eup %553 }
 0x107   :  { %v402_v11 = vmul.f32 %v554_v10, %v393_v63 }
 0x109   :  { %v556_v12 = vpop.eup %555  ;;  %404 = vst.msk [vmem:[%s697_s7] sm:$0xff] %vm403_vm7, %v402_v11 }
 0x10a   :  { %v484_v13 = vmul.f32 %v556_v12, %v475_v0 }
 0x10c   :  { %517 = vst.msk [vmem:[%s697_s7 + $0x8] sm:$0xff] %vm403_vm7, %v484_v13 }

</bundles_post_ra>
